<compile_context>
chip_gen: v7x
topology: tpu7x:2x2x1
jax: 0.10.0
libtpu: 0.0.40
codegen_flags: <defaults>
</compile_context>

<pallas_src>
import jax
import jax.numpy as jnp
from jax import lax
from jax.experimental import pallas as pl
from jax.experimental.pallas import tpu as pltpu


def rnn_lm_kernel(emb_ref, len_ref, wih_ref, whh_ref, b_ref, mean_ref):
    """Single-invocation kernel: RNN recurrence + masked mean over time.

    emb_ref : (L, Bp, Ep) bf16  time-major embedded tokens
    len_ref : (Bp, 1)     i32   sequence lengths (0 for padded batch rows)
    wih_ref : (Ep, Hp)    bf16  input->hidden weight (transposed vs torch, padded)
    whh_ref : (Hp, Hp)    f32   hidden->hidden weight (transposed vs torch, padded)
    b_ref   : (1, Hp)     f32   b_ih + b_hh (padded)
    mean_ref: (Bp, Hp)    f32   masked mean of hidden states (lane-dense output)
    """
    L, Bp, Ep = emb_ref.shape
    Hp = whh_ref.shape[0]

    lengths = len_ref[...]                      # (Bp, 1) int32
    whh = whh_ref[...]                          # (Hp, Hp) f32

    # --- Hoisted input projection: one big MXU matmul for all timesteps. ---
    x_all = emb_ref[...].reshape(L * Bp, Ep)                       # bf16
    xh = (jnp.dot(x_all, wih_ref[...], preferred_element_type=jnp.float32)
          + b_ref[...]).reshape(L, Bp, Hp)                         # (L, Bp, Hp) f32

    # --- Validity mask computed once (prefix mask: valid iff t < len_b). ---
    t_iota = lax.broadcasted_iota(jnp.int32, (L, Bp, Hp), 0)
    mask = (t_iota < lengths[None, :, :]).astype(jnp.float32)      # (L, Bp, Hp)

    # --- Recurrence: only h @ Whh + tanh on the serial critical path. ---
    # Static Python loop == full unroll (L is a small compile-time constant),
    # giving the scheduler cross-iteration visibility (MXU/EUP/VPU interleave).
    h = jnp.zeros((Bp, Hp), jnp.float32)
    acc = jnp.zeros((Bp, Hp), jnp.float32)
    for t in range(L):
        h = jnp.tanh(xh[t] + jnp.dot(h, whh, preferred_element_type=jnp.float32))
        acc = acc + mask[t] * h      # invalid steps contribute 0 (packed semantics)

    # pad_packed_sequence pads to max(lengths); mean(1) divides by that T_out.
    t_out = jnp.max(lengths).astype(jnp.float32)
    inv_t = 1.0 / jnp.maximum(t_out, 1.0)       # guard all-zero-length batches
    mean_ref[...] = acc * inv_t


def language_model_forward(indices, lengths, params):
    """indices: (B, L) int32, lengths: (B,) int32 -> logits (B, 2) float32."""
    emb = params["emb"]     # (V, Ep)  bf16, pad row & pad cols zero
    wih = params["wih"]     # (Ep, Hp) bf16
    whh = params["whh"]     # (Hp, Hp) f32
    b = params["b"]         # (1, Hp)  f32
    wo = params["wo"]       # (Hp, 2)  f32 (zero rows beyond H)
    bo = params["bo"]       # (1, 2)   f32

    B, L = indices.shape
    Ep = emb.shape[1]
    Hp = whh.shape[0]
    Bp = ((B + 7) // 8) * 8                      # sublane-dense batch

    # Pad batch; padded rows get length 0 and contribute nothing.
    idx_p = jnp.zeros((Bp, L), jnp.int32).at[:B].set(indices.astype(jnp.int32))
    len_p = jnp.zeros((Bp, 1), jnp.int32).at[:B, 0].set(lengths.astype(jnp.int32))

    # Time-major gather directly: transpose the tiny (B, L) index matrix, not
    # the (B, L, E) embedded tensor.
    emb_tm = jnp.take(emb, idx_p.T, axis=0)      # (L, Bp, Ep) bf16

    flops = 2 * L * Bp * (Ep + Hp) * Hp
    bytes_accessed = (L * Bp * Ep * 2 + Ep * Hp * 2 + Hp * Hp * 4
                      + Hp * 4 + Bp * 4 + Bp * Hp * 4)

    vmem = pl.BlockSpec(memory_space=pltpu.MemorySpace.VMEM)
    mean_h = pl.pallas_call(
        rnn_lm_kernel,
        out_shape=jax.ShapeDtypeStruct((Bp, Hp), jnp.float32),
        in_specs=[vmem] * 5,
        out_specs=vmem,
        cost_estimate=pl.CostEstimate(
            flops=flops,
            transcendentals=L * Bp * Hp,
            bytes_accessed=bytes_accessed),
        compiler_params=pltpu.CompilerParams(vmem_limit_bytes=32 * 1024 * 1024),
    )(emb_tm, len_p, wih, whh, b)                # (Bp, Hp) f32

    # Tiny (Hp, 2) head kept in XLA: keeps the kernel's output store lane-dense.
    logits = jnp.dot(mean_h[:B], wo) + bo        # (B, 2)
    return logits


def init_params(key, vocab_size, embed_size, hidden_size, pad_id):
    """Deterministic synthetic parameters matching the torch module's shapes,
    zero-padded to lane-dense (128) kernel layouts."""
    Ep = max(128, ((embed_size + 127) // 128) * 128)
    Hp = max(128, ((hidden_size + 127) // 128) * 128)

    k = jax.random.split(key, 6)
    bound = 1.0 / jnp.sqrt(hidden_size)
    emb = jax.random.normal(k[0], (vocab_size, embed_size), jnp.float32)
    emb = emb.at[pad_id].set(0.0)                            # padding_idx row = 0
    w_ih = jax.random.uniform(k[1], (hidden_size, embed_size), jnp.float32, -bound, bound)
    w_hh = jax.random.uniform(k[2], (hidden_size, hidden_size), jnp.float32, -bound, bound)
    b_ih = jax.random.uniform(k[3], (hidden_size,), jnp.float32, -bound, bound)
    b_hh = jax.random.uniform(k[4], (hidden_size,), jnp.float32, -bound, bound)
    lin_bound = 1.0 / jnp.sqrt(hidden_size)
    w_out = jax.random.uniform(k[5], (2, hidden_size), jnp.float32, -lin_bound, lin_bound)
    b_out = jnp.zeros((2,), jnp.float32)

    E, H = embed_size, hidden_size
    emb_p = jnp.pad(emb, ((0, 0), (0, Ep - E))).astype(jnp.bfloat16)
    wih_p = jnp.pad(w_ih.T, ((0, Ep - E), (0, Hp - H))).astype(jnp.bfloat16)  # (Ep, Hp)
    whh_p = jnp.pad(w_hh.T, ((0, Hp - H), (0, Hp - H)))                        # (Hp, Hp)
    b_p = jnp.pad((b_ih + b_hh).reshape(1, -1), ((0, 0), (0, Hp - H)))         # (1, Hp)
    wo_p = jnp.pad(w_out.T, ((0, Hp - H), (0, 0)))                             # (Hp, 2)
    return {
        "emb": emb_p,
        "wih": wih_p,
        "whh": whh_p,
        "b": b_p,
        "wo": wo_p,
        "bo": b_out.reshape(1, -1),
    }


if __name__ == "__main__":
    # Small shapes consistent with the forward: batch=2, seq=8, embed=32, hidden=32.
    B, L, E, H = 2, 8, 32, 32
    vocab_size, pad_id = 11, 0

    key = jax.random.PRNGKey(0)
    k_idx, k_par = jax.random.split(key)

    lengths = jnp.array([8, 5], dtype=jnp.int32)
    indices = jax.random.randint(k_idx, (B, L), 1, vocab_size, dtype=jnp.int32)
    # zero out (pad) positions beyond each sequence's length
    pos = jnp.arange(L)[None, :]
    indices = jnp.where(pos < lengths[:, None], indices, pad_id).astype(jnp.int32)

    params = init_params(k_par, vocab_size, E, H, pad_id)

    logits = language_model_forward(indices, lengths, params)
    jax.block_until_ready(logits)
    assert logits.shape == (B, 2) and logits.dtype == jnp.float32
    print("KERNEL_OK")
</pallas_src>

<mosaic_0001>
module attributes {stable_mosaic.version = 11 : i64} {
  func.func @rnn_lm_kernel(%arg0: memref<8x8x128xbf16, #tpu.memory_space<vmem>>, %arg1: memref<8x1xi32, #tpu.memory_space<vmem>>, %arg2: memref<128x128xbf16, #tpu.memory_space<vmem>>, %arg3: memref<128x128xf32, #tpu.memory_space<vmem>>, %arg4: memref<1x128xf32, #tpu.memory_space<vmem>>, %arg5: memref<8x128xf32, #tpu.memory_space<vmem>>) attributes {dimension_semantics = [], scalar_prefetch = 0 : i64, scratch_operands = 0 : i64, tpu.core_type = #tpu.core_type<tc>} {
    %c0 = arith.constant 0 : index
    %c0_0 = arith.constant 0 : index
    %0 = vector.load %arg1[%c0, %c0_0] : memref<8x1xi32, #tpu.memory_space<vmem>>, vector<8x1xi32>
    %c0_1 = arith.constant 0 : index
    %c0_2 = arith.constant 0 : index
    %1 = vector.load %arg3[%c0_1, %c0_2] : memref<128x128xf32, #tpu.memory_space<vmem>>, vector<128x128xf32>
    %c0_3 = arith.constant 0 : index
    %c0_4 = arith.constant 0 : index
    %c0_5 = arith.constant 0 : index
    %2 = vector.load %arg0[%c0_3, %c0_4, %c0_5] : memref<8x8x128xbf16, #tpu.memory_space<vmem>>, vector<8x8x128xbf16>
    %3 = vector.shape_cast %2 : vector<8x8x128xbf16> to vector<64x128xbf16>
    %c0_6 = arith.constant 0 : index
    %c0_7 = arith.constant 0 : index
    %4 = vector.load %arg2[%c0_6, %c0_7] : memref<128x128xbf16, #tpu.memory_space<vmem>>, vector<128x128xbf16>
    %cst = arith.constant dense<0.000000e+00> : vector<64x128xf32>
    %5 = tpu.matmul %3, %4, %cst {dimension_numbers = #tpu.dot_dimension_numbers<[1], [0], [0], [1], [0, 0, 1, 1], [], []>} : vector<64x128xbf16>, vector<128x128xbf16>, vector<64x128xf32> -> vector<64x128xf32>
    %c0_8 = arith.constant 0 : index
    %c0_9 = arith.constant 0 : index
    %6 = vector.load %arg4[%c0_8, %c0_9] : memref<1x128xf32, #tpu.memory_space<vmem>>, vector<1x128xf32>
    %7 = vector.broadcast %6 : vector<1x128xf32> to vector<64x128xf32>
    %8 = arith.addf %5, %7 : vector<64x128xf32>
    %9 = vector.shape_cast %8 : vector<64x128xf32> to vector<8x8x128xf32>
    %10 = tpu.iota {dimensions = array<i32: 0>} : vector<8x8x128xi32>
    %11 = vector.shape_cast %0 : vector<8x1xi32> to vector<1x8x1xi32>
    %12 = vector.broadcast %11 : vector<1x8x1xi32> to vector<8x8x128xi32>
    %13 = arith.cmpi slt, %10, %12 : vector<8x8x128xi32>
    %14 = arith.extui %13 : vector<8x8x128xi1> to vector<8x8x128xi32>
    %15 = arith.sitofp %14 : vector<8x8x128xi32> to vector<8x8x128xf32>
    %cst_10 = arith.constant 0.000000e+00 : f32
    %16 = vector.broadcast %cst_10 : f32 to vector<8x128xf32>
    %cst_11 = arith.constant 0.000000e+00 : f32
    %17 = vector.broadcast %cst_11 : f32 to vector<8x128xf32>
    %18 = vector.extract_strided_slice %9 {offsets = [0, 0, 0], sizes = [1, 8, 128], strides = [1, 1, 1]} : vector<8x8x128xf32> to vector<1x8x128xf32>
    %19 = vector.shape_cast %18 : vector<1x8x128xf32> to vector<8x128xf32>
    %cst_12 = arith.constant dense<0.000000e+00> : vector<8x128xf32>
    %20 = tpu.matmul %16, %1, %cst_12 {dimension_numbers = #tpu.dot_dimension_numbers<[1], [0], [0], [1], [0, 0, 1, 1], [], []>} : vector<8x128xf32>, vector<128x128xf32>, vector<8x128xf32> -> vector<8x128xf32>
    %21 = arith.addf %19, %20 : vector<8x128xf32>
    %22 = math.tanh %21 : vector<8x128xf32>
    %23 = vector.extract_strided_slice %15 {offsets = [0, 0, 0], sizes = [1, 8, 128], strides = [1, 1, 1]} : vector<8x8x128xf32> to vector<1x8x128xf32>
    %24 = vector.shape_cast %23 : vector<1x8x128xf32> to vector<8x128xf32>
    %25 = arith.mulf %24, %22 : vector<8x128xf32>
    %26 = arith.addf %17, %25 : vector<8x128xf32>
    %27 = vector.extract_strided_slice %9 {offsets = [1, 0, 0], sizes = [1, 8, 128], strides = [1, 1, 1]} : vector<8x8x128xf32> to vector<1x8x128xf32>
    %28 = vector.shape_cast %27 : vector<1x8x128xf32> to vector<8x128xf32>
    %cst_13 = arith.constant dense<0.000000e+00> : vector<8x128xf32>
    %29 = tpu.matmul %22, %1, %cst_13 {dimension_numbers = #tpu.dot_dimension_numbers<[1], [0], [0], [1], [0, 0, 1, 1], [], []>} : vector<8x128xf32>, vector<128x128xf32>, vector<8x128xf32> -> vector<8x128xf32>
    %30 = arith.addf %28, %29 : vector<8x128xf32>
    %31 = math.tanh %30 : vector<8x128xf32>
    %32 = vector.extract_strided_slice %15 {offsets = [1, 0, 0], sizes = [1, 8, 128], strides = [1, 1, 1]} : vector<8x8x128xf32> to vector<1x8x128xf32>
    %33 = vector.shape_cast %32 : vector<1x8x128xf32> to vector<8x128xf32>
    %34 = arith.mulf %33, %31 : vector<8x128xf32>
    %35 = arith.addf %26, %34 : vector<8x128xf32>
    %36 = vector.extract_strided_slice %9 {offsets = [2, 0, 0], sizes = [1, 8, 128], strides = [1, 1, 1]} : vector<8x8x128xf32> to vector<1x8x128xf32>
    %37 = vector.shape_cast %36 : vector<1x8x128xf32> to vector<8x128xf32>
    %cst_14 = arith.constant dense<0.000000e+00> : vector<8x128xf32>
    %38 = tpu.matmul %31, %1, %cst_14 {dimension_numbers = #tpu.dot_dimension_numbers<[1], [0], [0], [1], [0, 0, 1, 1], [], []>} : vector<8x128xf32>, vector<128x128xf32>, vector<8x128xf32> -> vector<8x128xf32>
    %39 = arith.addf %37, %38 : vector<8x128xf32>
    %40 = math.tanh %39 : vector<8x128xf32>
    %41 = vector.extract_strided_slice %15 {offsets = [2, 0, 0], sizes = [1, 8, 128], strides = [1, 1, 1]} : vector<8x8x128xf32> to vector<1x8x128xf32>
    %42 = vector.shape_cast %41 : vector<1x8x128xf32> to vector<8x128xf32>
    %43 = arith.mulf %42, %40 : vector<8x128xf32>
    %44 = arith.addf %35, %43 : vector<8x128xf32>
    %45 = vector.extract_strided_slice %9 {offsets = [3, 0, 0], sizes = [1, 8, 128], strides = [1, 1, 1]} : vector<8x8x128xf32> to vector<1x8x128xf32>
    %46 = vector.shape_cast %45 : vector<1x8x128xf32> to vector<8x128xf32>
    %cst_15 = arith.constant dense<0.000000e+00> : vector<8x128xf32>
    %47 = tpu.matmul %40, %1, %cst_15 {dimension_numbers = #tpu.dot_dimension_numbers<[1], [0], [0], [1], [0, 0, 1, 1], [], []>} : vector<8x128xf32>, vector<128x128xf32>, vector<8x128xf32> -> vector<8x128xf32>
    %48 = arith.addf %46, %47 : vector<8x128xf32>
    %49 = math.tanh %48 : vector<8x128xf32>
    %50 = vector.extract_strided_slice %15 {offsets = [3, 0, 0], sizes = [1, 8, 128], strides = [1, 1, 1]} : vector<8x8x128xf32> to vector<1x8x128xf32>
    %51 = vector.shape_cast %50 : vector<1x8x128xf32> to vector<8x128xf32>
    %52 = arith.mulf %51, %49 : vector<8x128xf32>
    %53 = arith.addf %44, %52 : vector<8x128xf32>
    %54 = vector.extract_strided_slice %9 {offsets = [4, 0, 0], sizes = [1, 8, 128], strides = [1, 1, 1]} : vector<8x8x128xf32> to vector<1x8x128xf32>
    %55 = vector.shape_cast %54 : vector<1x8x128xf32> to vector<8x128xf32>
    %cst_16 = arith.constant dense<0.000000e+00> : vector<8x128xf32>
    %56 = tpu.matmul %49, %1, %cst_16 {dimension_numbers = #tpu.dot_dimension_numbers<[1], [0], [0], [1], [0, 0, 1, 1], [], []>} : vector<8x128xf32>, vector<128x128xf32>, vector<8x128xf32> -> vector<8x128xf32>
    %57 = arith.addf %55, %56 : vector<8x128xf32>
    %58 = math.tanh %57 : vector<8x128xf32>
    %59 = vector.extract_strided_slice %15 {offsets = [4, 0, 0], sizes = [1, 8, 128], strides = [1, 1, 1]} : vector<8x8x128xf32> to vector<1x8x128xf32>
    %60 = vector.shape_cast %59 : vector<1x8x128xf32> to vector<8x128xf32>
    %61 = arith.mulf %60, %58 : vector<8x128xf32>
    %62 = arith.addf %53, %61 : vector<8x128xf32>
    %63 = vector.extract_strided_slice %9 {offsets = [5, 0, 0], sizes = [1, 8, 128], strides = [1, 1, 1]} : vector<8x8x128xf32> to vector<1x8x128xf32>
    %64 = vector.shape_cast %63 : vector<1x8x128xf32> to vector<8x128xf32>
    %cst_17 = arith.constant dense<0.000000e+00> : vector<8x128xf32>
    %65 = tpu.matmul %58, %1, %cst_17 {dimension_numbers = #tpu.dot_dimension_numbers<[1], [0], [0], [1], [0, 0, 1, 1], [], []>} : vector<8x128xf32>, vector<128x128xf32>, vector<8x128xf32> -> vector<8x128xf32>
    %66 = arith.addf %64, %65 : vector<8x128xf32>
    %67 = math.tanh %66 : vector<8x128xf32>
    %68 = vector.extract_strided_slice %15 {offsets = [5, 0, 0], sizes = [1, 8, 128], strides = [1, 1, 1]} : vector<8x8x128xf32> to vector<1x8x128xf32>
    %69 = vector.shape_cast %68 : vector<1x8x128xf32> to vector<8x128xf32>
    %70 = arith.mulf %69, %67 : vector<8x128xf32>
    %71 = arith.addf %62, %70 : vector<8x128xf32>
    %72 = vector.extract_strided_slice %9 {offsets = [6, 0, 0], sizes = [1, 8, 128], strides = [1, 1, 1]} : vector<8x8x128xf32> to vector<1x8x128xf32>
    %73 = vector.shape_cast %72 : vector<1x8x128xf32> to vector<8x128xf32>
    %cst_18 = arith.constant dense<0.000000e+00> : vector<8x128xf32>
    %74 = tpu.matmul %67, %1, %cst_18 {dimension_numbers = #tpu.dot_dimension_numbers<[1], [0], [0], [1], [0, 0, 1, 1], [], []>} : vector<8x128xf32>, vector<128x128xf32>, vector<8x128xf32> -> vector<8x128xf32>
    %75 = arith.addf %73, %74 : vector<8x128xf32>
    %76 = math.tanh %75 : vector<8x128xf32>
    %77 = vector.extract_strided_slice %15 {offsets = [6, 0, 0], sizes = [1, 8, 128], strides = [1, 1, 1]} : vector<8x8x128xf32> to vector<1x8x128xf32>
    %78 = vector.shape_cast %77 : vector<1x8x128xf32> to vector<8x128xf32>
    %79 = arith.mulf %78, %76 : vector<8x128xf32>
    %80 = arith.addf %71, %79 : vector<8x128xf32>
    %81 = vector.extract_strided_slice %9 {offsets = [7, 0, 0], sizes = [1, 8, 128], strides = [1, 1, 1]} : vector<8x8x128xf32> to vector<1x8x128xf32>
    %82 = vector.shape_cast %81 : vector<1x8x128xf32> to vector<8x128xf32>
    %cst_19 = arith.constant dense<0.000000e+00> : vector<8x128xf32>
    %83 = tpu.matmul %76, %1, %cst_19 {dimension_numbers = #tpu.dot_dimension_numbers<[1], [0], [0], [1], [0, 0, 1, 1], [], []>} : vector<8x128xf32>, vector<128x128xf32>, vector<8x128xf32> -> vector<8x128xf32>
    %84 = arith.addf %82, %83 : vector<8x128xf32>
    %85 = math.tanh %84 : vector<8x128xf32>
    %86 = vector.extract_strided_slice %15 {offsets = [7, 0, 0], sizes = [1, 8, 128], strides = [1, 1, 1]} : vector<8x8x128xf32> to vector<1x8x128xf32>
    %87 = vector.shape_cast %86 : vector<1x8x128xf32> to vector<8x128xf32>
    %88 = arith.mulf %87, %85 : vector<8x128xf32>
    %89 = arith.addf %80, %88 : vector<8x128xf32>
    %90 = vector.shape_cast %0 : vector<8x1xi32> to vector<1x8x1xi32>
    %cst_20 = arith.constant dense<-2147483648> : vector<1xi32>
    %91 = vector.multi_reduction <maxsi>, %90, %cst_20 [1, 2] : vector<1x8x1xi32> to vector<1xi32>
    %92 = vector.shape_cast %91 : vector<1xi32> to vector<1x1x1xi32>
    %93 = vector.extract %92[0, 0, 0] : i32 from vector<1x1x1xi32>
    %94 = arith.sitofp %93 : i32 to f32
    %cst_21 = arith.constant 1.000000e+00 : f32
    %95 = arith.maximumf %94, %cst_21 : f32
    %cst_22 = arith.constant 1.000000e+00 : f32
    %96 = arith.divf %cst_22, %95 : f32
    %97 = vector.broadcast %96 : f32 to vector<8x128xf32>
    %98 = arith.mulf %89, %97 : vector<8x128xf32>
    %c0_23 = arith.constant 0 : index
    %c0_24 = arith.constant 0 : index
    %99 = vector.load %arg5[%c0_23, %c0_24] : memref<8x128xf32, #tpu.memory_space<vmem>>, vector<8x128xf32>
    tpu.vector_store %arg5[%c0_23, %c0_24], %98 {strides = array<i32>} : memref<8x128xf32, #tpu.memory_space<vmem>>, vector<8x128xf32>,
    return
  }
}

</mosaic_0001>

<bundles_post_ra>
// kernel: tpu_custom_call.1
= control target key start
LH: loop header
LB: loop body
LE: loop exit
PB: predicated region body
PF: predicated region fallthrough
CT: control target
= control target key end

     0   :  { %10 = vsyncpa [#allocation3], 0  ;;  %s2040_s0 = inlined_call_operand.hbm [shape: bf16[8,8,128], index: 0, kind: input, shape index: {}]   ;;  %s2041_s1 = inlined_call_operand.vmem [shape: s32[8,1], index: 1, kind: input, shape index: {}]   ;;  %s2042_s2 = inlined_call_operand.hbm [shape: bf16[128,128], index: 2, kind: input, shape index: {}]   ;;  %s2043_s3 = inlined_call_operand.hbm [shape: f32[128,128], index: 3, kind: input, shape index: {}]   ;;  %s2044_s4 = inlined_call_operand.vmem [shape: f32[1,128], index: 4, kind: input, shape index: {}]   ;;  %s2045_s5 = inlined_call_operand.hbm [shape: f32[8,128], index: 5, kind: output, shape index: {}]  }
   0x1   :  { %11 = vsyncpa [#allocation6], 0 }
   0x2   :  { %12 = vsyncpa [#allocation4], 0  ;;  %s1725_s18 = smov [#allocation5]   ;;  %s1726_s20 = smov [#allocation2]  }
   0x3   :  { %s32_s19 = sshll.u32 %s1725_s18, 4  ;;  %s18_s21 = sshll.u32 %s1726_s20, 4  ;;  %s33_s19 = int_to_ptr.vmem [resolvable:$true] %s32_s19  ;;  %s1768_s21 = int_to_ptr.vmem [resolvable:$true] %s18_s21 }
   0x4   :  { %s1631_s24 = scalar_lea.hbm %s2042_s2, 1024 }
   0x5   :  { %p1632_p0 = scmp.ne.s32.totalorder %s2042_s2, %s1631_s24  ;;  %p1635_p1 = scmp.lt.u32.totalorder %s1631_s24, %s2042_s2 }
   0x7   :  { %p1637_p2 = pnand %p1635_p1, %p1632_p0 }
   0x9   :  { %1640 = shalt.err (!%p1637_p2)
}
   0xa   :  { %s1641_s29 = scalar_lea.vmem %s33_s19, 1024  ;;  %p1646_p4 = scmp.lt.s32.totalorder %s33_s19, %s33_s19 }
   0xb   :  { %p1642_p3 = scmp.ne.s32.totalorder %s33_s19, %s1641_s29  ;;  %p1647_p5 = scmp.lt.s32.totalorder %s1641_s29, %s1641_s29 }
   0xd   :  { %p1648_p6 = por %p1647_p5, %p1646_p4 }
   0xf   :  { %p1649_p7 = pnand %p1648_p6, %p1642_p3 }
  0x11   :  { %1652 = shalt.err (!%p1649_p7)
}
  0x12   :  { %s1727_s30 = smov 64   ;;  %s1728_s6 = smov 4  }
  0x13   :  { %38 = dma.hbm_to_vmem [thread:$0]  %s2042_s2, 1024, %s33_s19, [#allocation6], %s1727_s30, %s1727_s30, %s1728_s6  }
  0x14   :  { %s1653_s11 = scalar_lea.hbm %s2040_s0, 512 }
  0x15   :  { %p1654_p8 = scmp.ne.s32.totalorder %s2040_s0, %s1653_s11  ;;  %p1657_p9 = scmp.lt.u32.totalorder %s1653_s11, %s2040_s0 }
  0x17   :  { %p1659_p10 = pnand %p1657_p9, %p1654_p8 }
  0x19   :  { %1662 = shalt.err (!%p1659_p10)
}
  0x1a   :  { %s1663_s16 = scalar_lea.vmem %s1768_s21, 512  ;;  %p1668_p12 = scmp.lt.s32.totalorder %s1768_s21, %s1768_s21 }
  0x1b   :  { %p1664_p11 = scmp.ne.s32.totalorder %s1768_s21, %s1663_s16  ;;  %p1669_p13 = scmp.lt.s32.totalorder %s1663_s16, %s1663_s16 }
  0x1d   :  { %p1670_p0 = por %p1669_p13, %p1668_p12 }
  0x1f   :  { %p1671_p1 = pnand %p1670_p0, %p1664_p11 }
  0x21   :  { %1674 = shalt.err (!%p1671_p1)
}
  0x22   :  { %24 = dma.hbm_to_vmem [thread:$0]  %s2040_s0, 512, %s1768_s21, [#allocation3], %s1727_s30, %s1727_s30, %s1728_s6  }
  0x23   :  { %s1729_s18 = smov [#allocation7]   ;;  %s1675_s23 = scalar_lea.hbm %s2043_s3, 2048 }
  0x24   :  { %s44_s19 = sshll.u32 %s1729_s18, 4  ;;  %p1676_p2 = scmp.ne.s32.totalorder %s2043_s3, %s1675_s23  ;;  %s45_s19 = int_to_ptr.vmem [resolvable:$true] %s44_s19 }
  0x25   :  { %p1679_p3 = scmp.lt.u32.totalorder %s1675_s23, %s2043_s3 }
  0x27   :  { %p1681_p4 = pnand %p1679_p3, %p1676_p2 }
  0x29   :  { %1684 = shalt.err (!%p1681_p4)
}
  0x2a   :  { %s1685_s28 = scalar_lea.vmem %s45_s19, 2048  ;;  %p1690_p6 = scmp.lt.s32.totalorder %s45_s19, %s45_s19 }
  0x2b   :  { %p1686_p5 = scmp.ne.s32.totalorder %s45_s19, %s1685_s28  ;;  %p1691_p7 = scmp.lt.s32.totalorder %s1685_s28, %s1685_s28 }
  0x2d   :  { %p1692_p8 = por %p1691_p7, %p1690_p6 }
  0x2f   :  { %p1693_p9 = pnand %p1692_p8, %p1686_p5 }
  0x31   :  { %1696 = shalt.err (!%p1693_p9)
}
  0x32   :  { %s1730_s0 = smov 128   ;;  %s1731_s21 = smov 8  }
  0x33   :  { %50 = dma.hbm_to_vmem [thread:$0]  %s2043_s3, 2048, %s45_s19, [#allocation6], %s1730_s0, %s1730_s0, %s1731_s21  }
  0x34   :  { %1719 = dma.done.wait [#allocation3], 512  }
  0x35   :  { %1720 = vsyncadd [#allocation3], 4294966784 }
  0x36   :  { %1721 = dma.done.wait [#allocation6], 3072  }
  0x37   :  { %1722 = vsyncadd [#allocation6], 4294964224  ;;  %v1732_v0 = vmov 0.0|0.0   ;;  %vm1733_vm0 = vmmov 0   ;;  %v1734_v1 = vmov 0.0   ;;  %v1735_v2 = vmov 0  }
  0x38   :  { %1390 = vmatprep.subr.bf16.mxu1 %v1732_v0  ;;  %1142 = vmatprep.mubr.msk.f32.mxu1 %vm1733_vm0, %v1734_v1  ;;  %v1601_v3 = vld [vmem:[#allocation5] sm:$0xff]   ;;  %v65_v5 = vld [vmem:[#allocation7 + $0x8] sm:$0xff]  ;;  %v66_v8 = vld [vmem:[#allocation7 + $0x10] sm:$0xff]  ;;  %vm867_vm5 = vcmask 7168   ;;  %s1736_s9 = smov 1.0   ;;  %s1737_s12 = smov [#allocation8]  }
  0x39   :  { %1599 = vset.pattern.permute.xlu1 %v1735_v2  ;;  %1600 = vset.pattern.permute.xlu0 %v1735_v2  ;;  %v64_v4 = vld [vmem:[#allocation7] sm:$0xff]  ;;  %v1602_v7 = vld [vmem:[#allocation5 + $0x8] sm:$0xff]   ;;  %v67_v9 = vld [vmem:[#allocation7 + $0x18] sm:$0xff]  ;;  %s907_s13 = sshll.u32 %s1737_s12, 4  ;;  %s908_s13 = int_to_ptr.vmem [resolvable:$true] %s907_s13 }
  0x3a   :  { %1086 = vmatprep.subr.bf16.mxu0 %v1601_v3  ;;  %v1814_v6 = vpack.c.bf16 %v65_v5, %v64_v4  ;;  %v1817_v10 = vpack.c.bf16 %v67_v9, %v66_v8  ;;  %v1603_v11 = vld [vmem:[#allocation5 + $0x10] sm:$0xff]   ;;  %v68_v12 = vld [vmem:[#allocation7 + $0x20] sm:$0xff]  ;;  %v69_v13 = vld [vmem:[#allocation7 + $0x28] sm:$0xff]  ;;  %s1697_s14 = scalar_lea.vmem %s908_s13, 128  ;;  %p1702_p11 = scmp.lt.s32.totalorder %s908_s13, %s908_s13 }
  0x3b   :  { %1087 = vmatpush3.bf16.msra.mxu0 %v1601_v3  ;;  %v1821_v14 = vpack.c.bf16 %v69_v13, %v68_v12  ;;  %v1604_v15 = vld [vmem:[#allocation5 + $0x18] sm:$0xff]   ;;  %v70_v16 = vld [vmem:[#allocation7 + $0x30] sm:$0xff]  ;;  %v1605_v18 = vld [vmem:[#allocation5 + $0x20] sm:$0xff]   ;;  %p1698_p10 = scmp.ne.s32.totalorder %s908_s13, %s1697_s14  ;;  %p1703_p12 = scmp.lt.s32.totalorder %s1697_s14, %s1697_s14 }
  0x3c   :  { %1392 = vmatpush3.bf16.msra.mxu1 %v1814_v6  ;;  %1088 = vmatprep.subr.bf16.mxu0 %v1602_v7  ;;  %v71_v17 = vld [vmem:[#allocation7 + $0x38] sm:$0xff]  ;;  %v72_v20 = vld [vmem:[#allocation7 + $0x40] sm:$0xff]  ;;  %v73_v21 = vld [vmem:[#allocation7 + $0x48] sm:$0xff] }
  0x3d   :  { %1393 = vmatprep.subr.bf16.mxu1 %v1732_v0  ;;  %v1825_v19 = vpack.c.bf16 %v71_v17, %v70_v16  ;;  %v1609_v22 = vld [vmem:[#allocation2] sm:$0xff]   ;;  %v1834_v24 = vpack.c.bf16 %v73_v21, %v72_v20  ;;  %v1606_v25 = vld [vmem:[#allocation5 + $0x28] sm:$0xff]   ;;  %v74_v26 = vld [vmem:[#allocation7 + $0x50] sm:$0xff]  ;;  %p1704_p13 = por %p1703_p12, %p1702_p11 }
  0x3e   :  { %1102 = vmatprep.mubr.bf16.mxu0 %v1609_v22  ;;  %v1831_v23 = vld [vmem:[%s2041_s1] sm:$0xff]  ;;  %v75_v27 = vld [vmem:[#allocation7 + $0x58] sm:$0xff]  ;;  %v1607_v29 = vld [vmem:[#allocation5 + $0x30] sm:$0xff]  }
  0x3f   :  { %1089 = vmatpush3.bf16.msra.mxu0 %v1602_v7  ;;  %249 = vperm.xlu1 %1599, %v1831_v23   ;;  %v1839_v28 = vpack.c.bf16 %v75_v27, %v74_v26  ;;  %v76_v30 = vld [vmem:[#allocation7 + $0x60] sm:$0xff]  ;;  %v77_v31 = vld [vmem:[#allocation7 + $0x68] sm:$0xff]  ;;  %v1608_v33 = vld [vmem:[#allocation5 + $0x38] sm:$0xff]   ;;  %p1705_p0 = pnand %p1704_p13, %p1698_p10 }
  0x40   :  { %1395 = vmatpush3.bf16.msra.mxu1 %v1817_v10  ;;  %1090 = vmatprep.subr.bf16.mxu0 %v1603_v11  ;;  %v1843_v32 = vpack.c.bf16 %v77_v31, %v76_v30  ;;  %v78_v34 = vld [vmem:[#allocation7 + $0x70] sm:$0xff]  ;;  %v79_v35 = vld [vmem:[#allocation7 + $0x78] sm:$0xff]  ;;  %v1610_v37 = vld [vmem:[#allocation2 + $0x8] sm:$0xff]  }
  0x41   :  { %1396 = vmatprep.subr.bf16.mxu1 %v1732_v0  ;;  %v1847_v36 = vpack.c.bf16 %v79_v35, %v78_v34  ;;  %v1611_v38 = vld [vmem:[#allocation2 + $0x10] sm:$0xff]   ;;  %v1612_v39 = vld [vmem:[#allocation2 + $0x18] sm:$0xff]   ;;  %v1893_v40 = vld [vmem:[%s2044_s4] ss:$0 sm:$0xff] }
  0x43   :  { %1091 = vmatpush3.bf16.msra.mxu0 %v1603_v11 }
  0x44   :  { %1398 = vmatpush3.bf16.msra.mxu1 %v1821_v14  ;;  %1092 = vmatprep.subr.bf16.mxu0 %v1604_v15 }
  0x45   :  { %1399 = vmatprep.subr.bf16.mxu1 %v1732_v0 }
  0x47   :  { %1093 = vmatpush3.bf16.msra.mxu0 %v1604_v15 }
  0x48   :  { %1401 = vmatpush3.bf16.msra.mxu1 %v1825_v19  ;;  %1094 = vmatprep.subr.bf16.mxu0 %v1605_v18 }
  0x49   :  { %1402 = vmatprep.subr.bf16.mxu1 %v1732_v0 }
  0x4b   :  { %1095 = vmatpush3.bf16.msra.mxu0 %v1605_v18 }
  0x4c   :  { %1404 = vmatpush3.bf16.msra.mxu1 %v1834_v24  ;;  %1096 = vmatprep.subr.bf16.mxu0 %v1606_v25 }
  0x4d   :  { %1405 = vmatprep.subr.bf16.mxu1 %v1732_v0 }
  0x4f   :  { %1097 = vmatpush3.bf16.msra.mxu0 %v1606_v25  ;;  %v868_v25 = vsel %vm867_vm5, %v1831_v23, 2147483648 }
  0x50   :  { %1407 = vmatpush3.bf16.msra.mxu1 %v1839_v28  ;;  %1098 = vmatprep.subr.bf16.mxu0 %v1607_v29  ;;  %v870_v26 = vshra.s32 %v868_v25, 16 }
  0x51   :  { %1408 = vmatprep.subr.bf16.mxu1 %v1732_v0 }
  0x52   :  { %v872_v27 = vcvt.s32.f32 %v870_v26 }
  0x53   :  { %1099 = vmatpush3.bf16.msra.mxu0 %v1607_v29 }
  0x54   :  { %1410 = vmatpush3.bf16.msra.mxu1 %v1843_v32  ;;  %1100 = vmatprep.subr.bf16.mxu0 %v1608_v33 }
  0x55   :  { %1411 = vmatprep.subr.bf16.mxu1 %v1732_v0  ;;  %873 = vmax.xlane.f32.xlu0 %v872_v27 }
  0x57   :  { %1101 = vmatpush3.bf16.msra.mxu0 %v1608_v33 }
  0x58   :  { %1413 = vmatpush3.bf16.msra.mxu1 %v1847_v36  ;;  %1414 = vmatprep.subr.bf16.mxu0 %v1732_v0 }
  0x59   :  { %1438 = vmatprep.subr.bf16.mxu1 %v1732_v0 }
  0x5a   :  { %1103 = vmatmul.mubr.bf16.vlgmr.msra.gmra.mrb[0].mxu0 %v1610_v37 }
  0x5b   :  { %1143 = vmatmul.mubr.f32.vlgmr.msra.gmra.mrb[0].mxu1 %v1734_v1  ;;  %1416 = vmatpush3.bf16.msra.mxu0 %v1814_v6 }
  0x5c   :  { %1417 = vmatprep.subr.bf16.mxu0 %v1732_v0  ;;  %1440 = vmatpush3.bf16.msra.mxu1 %v1814_v6 }
  0x5d   :  { %1441 = vmatprep.subr.bf16.mxu1 %v1732_v0  ;;  %1212 = vmatprep.mubr.msk.f32.mxu1 %vm1733_vm0, %v1734_v1 }
  0x5e   :  { %1106 = vmatprep.mubr.bf16.mxu0 %v1611_v38 }
  0x5f   :  { %1419 = vmatpush3.bf16.msra.mxu0 %v1817_v10 }
  0x60   :  { %1420 = vmatprep.subr.bf16.mxu0 %v1732_v0  ;;  %1443 = vmatpush3.bf16.msra.mxu1 %v1817_v10 }
  0x61   :  { %1444 = vmatprep.subr.bf16.mxu1 %v1732_v0 }
  0x62   :  { %1107 = vmatmul.mubr.bf16.gmra.mrb[4].mxu0 %v1612_v39 }
  0x63   :  { %1422 = vmatpush3.bf16.msra.mxu0 %v1821_v14  ;;  %1177 = vmatprep.mubr.msk.f32.mxu0 %vm1733_vm0, %v1734_v1 }
  0x64   :  { %1423 = vmatprep.subr.bf16.mxu0 %v1732_v0  ;;  %1446 = vmatpush3.bf16.msra.mxu1 %v1821_v14 }
  0x65   :  { %1447 = vmatprep.subr.bf16.mxu1 %v1732_v0 }
  0x67   :  { %1425 = vmatpush3.bf16.msra.mxu0 %v1825_v19 }
  0x68   :  { %1426 = vmatprep.subr.bf16.mxu0 %v1732_v0  ;;  %1449 = vmatpush3.bf16.msra.mxu1 %v1825_v19 }
  0x69   :  { %1450 = vmatprep.subr.bf16.mxu1 %v1732_v0 }
  0x6b   :  { %1428 = vmatpush3.bf16.msra.mxu0 %v1834_v24 }
  0x6c   :  { %1429 = vmatprep.subr.bf16.mxu0 %v1732_v0  ;;  %1452 = vmatpush3.bf16.msra.mxu1 %v1834_v24 }
  0x6d   :  { %1453 = vmatprep.subr.bf16.mxu1 %v1732_v0 }
  0x6f   :  { %1431 = vmatpush3.bf16.msra.mxu0 %v1839_v28 }
  0x70   :  { %1432 = vmatprep.subr.bf16.mxu0 %v1732_v0  ;;  %1455 = vmatpush3.bf16.msra.mxu1 %v1839_v28 }
  0x71   :  { %1456 = vmatprep.subr.bf16.mxu1 %v1732_v0 }
  0x73   :  { %1434 = vmatpush3.bf16.msra.mxu0 %v1843_v32 }
  0x74   :  { %1435 = vmatprep.subr.bf16.mxu0 %v1732_v0  ;;  %1458 = vmatpush3.bf16.msra.mxu1 %v1843_v32 }
  0x75   :  { %1459 = vmatprep.subr.bf16.mxu1 %v1732_v0 }
  0x77   :  { %1437 = vmatpush3.bf16.msra.mxu0 %v1847_v36 }
  0x78   :  { %1461 = vmatpush3.bf16.msra.mxu1 %v1847_v36  ;;  %1462 = vmatprep.subr.bf16.mxu0 %v1732_v0 }
  0x79   :  { %1486 = vmatprep.subr.bf16.mxu1 %v1732_v0 }
  0xbe   :  { %v1927_v58 = vpop.permute.xlu1 %249 }
  0xbf   :  { %vm251_vm1 = vcmp.gt.s32.totalorder %v1927_v58, 0  ;;  %vm252_vm2 = vcmp.gt.s32.totalorder %v1927_v58, 1  ;;  %vm253_vm3 = vcmp.gt.s32.totalorder %v1927_v58, 2  ;;  %vm254_vm4 = vcmp.gt.s32.totalorder %v1927_v58, 3 }
  0xc0   :  { %v930_v59 = vsel %vm251_vm1, 1.0, %v1734_v1  ;;  %v931_v60 = vsel %vm252_vm2, 1.0, %v1734_v1  ;;  %v932_v8 = vsel %vm253_vm3, 1.0, %v1734_v1  ;;  %v933_v18 = vsel %vm254_vm4, 1.0, %v1734_v1 }
  0xc1   :  { %vm255_vm6 = vcmp.gt.s32.totalorder %v1927_v58, 4  ;;  %vm256_vm8 = vcmp.gt.s32.totalorder %v1927_v58, 5  ;;  %vm257_vm12 = vcmp.gt.s32.totalorder %v1927_v58, 6  ;;  %vm258_vm13 = vcmp.gt.s32.totalorder %v1927_v58, 7 }
  0xc2   :  { %v934_v34 = vsel %vm255_vm6, 1.0, %v1734_v1 }
 0x12d   :  { %v1895_v41 = vpop.f32.mrb[0].mxu0 }
 0x12e   :  { %v217_v42 = vpop.f32.mrb[1].mxu0  ;;  %v341_v43 = vpop.f32.mrb[0].mxu1  ;;  %v226_v3 = vadd.f32 %v1895_v41, %v1893_v40 }
 0x12f   :  { %v218_v44 = vadd.f32 %v1893_v40, %v217_v42  ;;  %v1898_v45 = vpop.f32.mrb[2].mxu0  ;;  %v1144_v46 = vpop.f32.mrb[1].mxu1 }
 0x130   :  { %v220_v47 = vpop.f32.mrb[3].mxu0  ;;  %v229_v13 = vadd.f32 %v1898_v45, %v1893_v40 }
 0x131   :  { %v345_v48 = vadd.f32 %v341_v43, %v218_v44  ;;  %v221_v54 = vadd.f32 %v1893_v40, %v220_v47 }
 0x133   :  { %1613 = vtanh.f32 %v345_v48 }
 0x135   :  { %v1918_v50 = vpop.f32.mrb[4].mxu0 }
 0x136   :  { %v1920_v51 = vpop.f32.mrb[5].mxu0 }
 0x137   :  { %v1922_v52 = vpop.f32.mrb[6].mxu0  ;;  %v234_v29 = vadd.f32 %v1893_v40, %v1920_v51 }
 0x138   :  { %v1924_v53 = vpop.f32.mrb[7].mxu0 }
 0x13d   :  { %v1614_v49 = vpop.eup %1613 }
 0x13e   :  { %1178 = vmatmul.mubr.f32.vlgmr.msra.gmra.mrb[8].mxu0 %v1614_v49  ;;  %v347_v62 = vmul.f32 %v1614_v49, %v930_v59 }
 0x13f   :  { %1464 = vmatpush3.bf16.msra.mxu0 %v1814_v6  ;;  %1247 = vmatprep.mubr.msk.f32.mxu0 %vm1733_vm0, %v1734_v1 }
 0x140   :  { %1465 = vmatprep.subr.bf16.mxu0 %v1732_v0 }
 0x143   :  { %1467 = vmatpush3.bf16.msra.mxu0 %v1817_v10 }
 0x144   :  { %1468 = vmatprep.subr.bf16.mxu0 %v1732_v0 }
 0x147   :  { %1470 = vmatpush3.bf16.msra.mxu0 %v1821_v14 }
 0x148   :  { %1471 = vmatprep.subr.bf16.mxu0 %v1732_v0 }
 0x14b   :  { %1473 = vmatpush3.bf16.msra.mxu0 %v1825_v19 }
 0x14c   :  { %1474 = vmatprep.subr.bf16.mxu0 %v1732_v0 }
 0x14f   :  { %1476 = vmatpush3.bf16.msra.mxu0 %v1834_v24 }
 0x150   :  { %1477 = vmatprep.subr.bf16.mxu0 %v1732_v0 }
 0x153   :  { %1479 = vmatpush3.bf16.msra.mxu0 %v1839_v28 }
 0x154   :  { %1480 = vmatprep.subr.bf16.mxu0 %v1732_v0 }
 0x157   :  { %1482 = vmatpush3.bf16.msra.mxu0 %v1843_v32 }
 0x158   :  { %1483 = vmatprep.subr.bf16.mxu0 %v1732_v0 }
 0x15b   :  { %1485 = vmatpush3.bf16.msra.mxu0 %v1847_v36 }
 0x15c   :  { %1510 = vmatprep.subr.bf16.mxu0 %v1732_v0 }
 0x211   :  { %v415_v55 = vpop.f32.mrb[8].mxu0 }
 0x212   :  { %v419_v56 = vadd.f32 %v415_v55, %v221_v54  ;;  %v1179_v57 = vpop.f32.mrb[9].mxu0 }
 0x213   :  { %v242_v57 = vadd.f32 %v1918_v50, %v1893_v40 }
 0x214   :  { %1615 = vtanh.f32 %v419_v56 }
 0x21e   :  { %v1616_v61 = vpop.eup %1615 }
 0x21f   :  { %v421_v63 = vmul.f32 %v1616_v61, %v931_v60  ;;  %1213 = vmatmul.mubr.f32.vlgmr.msra.gmra.mrb[2].mxu1 %v1616_v61 }
 0x220   :  { %1488 = vmatpush3.bf16.msra.mxu1 %v1814_v6  ;;  %1282 = vmatprep.mubr.msk.f32.mxu1 %vm1733_vm0, %v1734_v1 }
 0x221   :  { %v422_v2 = vadd.f32 %v421_v63, %v347_v62  ;;  %1489 = vmatprep.subr.bf16.mxu1 %v1732_v0  ;;  %v936_v62 = vsel %vm257_vm12, 1.0, %v1734_v1 }
 0x224   :  { %1491 = vmatpush3.bf16.msra.mxu1 %v1817_v10 }
 0x225   :  { %1492 = vmatprep.subr.bf16.mxu1 %v1732_v0 }
 0x228   :  { %1494 = vmatpush3.bf16.msra.mxu1 %v1821_v14 }
 0x229   :  { %1495 = vmatprep.subr.bf16.mxu1 %v1732_v0 }
 0x22c   :  { %1497 = vmatpush3.bf16.msra.mxu1 %v1825_v19 }
 0x22d   :  { %1498 = vmatprep.subr.bf16.mxu1 %v1732_v0 }
 0x230   :  { %1500 = vmatpush3.bf16.msra.mxu1 %v1834_v24 }
 0x231   :  { %1501 = vmatprep.subr.bf16.mxu1 %v1732_v0 }
 0x234   :  { %1503 = vmatpush3.bf16.msra.mxu1 %v1839_v28 }
 0x235   :  { %1504 = vmatprep.subr.bf16.mxu1 %v1732_v0 }
 0x238   :  { %1506 = vmatpush3.bf16.msra.mxu1 %v1843_v32 }
 0x239   :  { %1507 = vmatprep.subr.bf16.mxu1 %v1732_v0 }
 0x23c   :  { %1509 = vmatpush3.bf16.msra.mxu1 %v1847_v36 }
 0x23d   :  { %1534 = vmatprep.subr.bf16.mxu1 %v1732_v0 }
 0x2f2   :  { %v489_v4 = vpop.f32.mrb[2].mxu1 }
 0x2f3   :  { %v493_v5 = vadd.f32 %v489_v4, %v226_v3  ;;  %v1214_v7 = vpop.f32.mrb[3].mxu1  ;;  %v245_v4 = vadd.f32 %v1922_v52, %v1893_v40 }
 0x2f5   :  { %1617 = vtanh.f32 %v493_v5 }
 0x2ff   :  { %v1618_v9 = vpop.eup %1617 }
 0x300   :  { %v495_v11 = vmul.f32 %v1618_v9, %v932_v8  ;;  %1248 = vmatmul.mubr.f32.vlgmr.msra.gmra.mrb[10].mxu0 %v1618_v9  ;;  %v937_v9 = vsel %vm258_vm13, 1.0, %v1734_v1 }
 0x301   :  { %1512 = vmatpush3.bf16.msra.mxu0 %v1814_v6  ;;  %1317 = vmatprep.mubr.msk.f32.mxu0 %vm1733_vm0, %v1734_v1 }
 0x302   :  { %v496_v12 = vadd.f32 %v495_v11, %v422_v2  ;;  %1513 = vmatprep.subr.bf16.mxu0 %v1732_v0 }
 0x305   :  { %1515 = vmatpush3.bf16.msra.mxu0 %v1817_v10 }
 0x306   :  { %1516 = vmatprep.subr.bf16.mxu0 %v1732_v0 }
 0x309   :  { %1518 = vmatpush3.bf16.msra.mxu0 %v1821_v14 }
 0x30a   :  { %1519 = vmatprep.subr.bf16.mxu0 %v1732_v0 }
 0x30d   :  { %1521 = vmatpush3.bf16.msra.mxu0 %v1825_v19 }
 0x30e   :  { %1522 = vmatprep.subr.bf16.mxu0 %v1732_v0 }
 0x311   :  { %1524 = vmatpush3.bf16.msra.mxu0 %v1834_v24 }
 0x312   :  { %1525 = vmatprep.subr.bf16.mxu0 %v1732_v0 }
 0x315   :  { %1527 = vmatpush3.bf16.msra.mxu0 %v1839_v28 }
 0x316   :  { %1528 = vmatprep.subr.bf16.mxu0 %v1732_v0 }
 0x319   :  { %1530 = vmatpush3.bf16.msra.mxu0 %v1843_v32 }
 0x31a   :  { %1531 = vmatprep.subr.bf16.mxu0 %v1732_v0 }
 0x31d   :  { %1533 = vmatpush3.bf16.msra.mxu0 %v1847_v36 }
 0x31e   :  { %1558 = vmatprep.subr.bf16.mxu0 %v1732_v0 }
 0x3d3   :  { %v563_v15 = vpop.f32.mrb[10].mxu0 }
 0x3d4   :  { %v567_v16 = vadd.f32 %v563_v15, %v229_v13  ;;  %v1249_v17 = vpop.f32.mrb[11].mxu0 }
 0x3d6   :  { %1619 = vtanh.f32 %v567_v16 }
 0x3e0   :  { %v1620_v20 = vpop.eup %1619 }
 0x3e1   :  { %v569_v21 = vmul.f32 %v1620_v20, %v933_v18  ;;  %1283 = vmatmul.mubr.f32.vlgmr.msra.gmra.mrb[4].mxu1 %v1620_v20 }
 0x3e2   :  { %1536 = vmatpush3.bf16.msra.mxu1 %v1814_v6  ;;  %1352 = vmatprep.mubr.msk.f32.mxu1 %vm1733_vm0, %v1734_v1 }
 0x3e3   :  { %1537 = vmatprep.subr.bf16.mxu1 %v1732_v0  ;;  %v570_v22 = vadd.f32 %v569_v21, %v496_v12 }
 0x3e6   :  { %1539 = vmatpush3.bf16.msra.mxu1 %v1817_v10 }
 0x3e7   :  { %1540 = vmatprep.subr.bf16.mxu1 %v1732_v0 }
 0x3ea   :  { %1542 = vmatpush3.bf16.msra.mxu1 %v1821_v14 }
 0x3eb   :  { %1543 = vmatprep.subr.bf16.mxu1 %v1732_v0 }
 0x3ee   :  { %1545 = vmatpush3.bf16.msra.mxu1 %v1825_v19 }
 0x3ef   :  { %1546 = vmatprep.subr.bf16.mxu1 %v1732_v0 }
 0x3f2   :  { %1548 = vmatpush3.bf16.msra.mxu1 %v1834_v24 }
 0x3f3   :  { %1549 = vmatprep.subr.bf16.mxu1 %v1732_v0 }
 0x3f6   :  { %1551 = vmatpush3.bf16.msra.mxu1 %v1839_v28 }
 0x3f7   :  { %1552 = vmatprep.subr.bf16.mxu1 %v1732_v0 }
 0x3fa   :  { %1554 = vmatpush3.bf16.msra.mxu1 %v1843_v32 }
 0x3fb   :  { %1555 = vmatprep.subr.bf16.mxu1 %v1732_v0 }
 0x3fe   :  { %1557 = vmatpush3.bf16.msra.mxu1 %v1847_v36 }
 0x4b4   :  { %v637_v30 = vpop.f32.mrb[4].mxu1 }
 0x4b5   :  { %v641_v31 = vadd.f32 %v637_v30, %v234_v29  ;;  %v1284_v33 = vpop.f32.mrb[5].mxu1 }
 0x4b7   :  { %1621 = vtanh.f32 %v641_v31 }
 0x4c1   :  { %v1622_v35 = vpop.eup %1621 }
 0x4c2   :  { %v643_v37 = vmul.f32 %v1622_v35, %v934_v34  ;;  %1318 = vmatmul.mubr.f32.vlgmr.msra.gmra.mrb[12].mxu0 %v1622_v35 }
 0x4c3   :  { %1560 = vmatpush3.bf16.msra.mxu0 %v1814_v6  ;;  %1387 = vmatprep.mubr.msk.f32.mxu0 %vm1733_vm0, %v1734_v1  ;;  %v869_v6 = vand.u32 65535, %v868_v25 }
 0x4c4   :  { %1561 = vmatprep.subr.bf16.mxu0 %v1732_v0  ;;  %v644_v23 = vadd.f32 %v643_v37, %v570_v22 }
 0x4c7   :  { %1563 = vmatpush3.bf16.msra.mxu0 %v1817_v10  ;;  %v874_v10 = vpop.xlane.xlu0 %873 }
 0x4c8   :  { %1564 = vmatprep.subr.bf16.mxu0 %v1732_v0  ;;  %vm875_vm7 = vcmp.eq.f32.partialorder %v872_v27, %v874_v10  ;;  %v880_v42 = vcvt.f32.s32 %v874_v10 }
 0x4ca   :  { %v881_v43 = vshll.u32 %v880_v42, 16 }
 0x4cb   :  { %1566 = vmatpush3.bf16.msra.mxu0 %v1821_v14  ;;  %v871_v14 = vcvt.s32.f32 %v869_v6 }
 0x4cc   :  { %1567 = vmatprep.subr.bf16.mxu0 %v1732_v0 }
 0x4cf   :  { %1569 = vmatpush3.bf16.msra.mxu0 %v1825_v19  ;;  %v876_v19 = vsel %vm875_vm7, %v871_v14, -inf }
 0x4d0   :  { %1570 = vmatprep.subr.bf16.mxu0 %v1732_v0  ;;  %877 = vmax.xlane.f32.xlu0 %v876_v19 }
 0x4d3   :  { %1572 = vmatpush3.bf16.msra.mxu0 %v1834_v24  ;;  %v237_v24 = vadd.f32 %v1893_v40, %v1924_v53 }
 0x4d4   :  { %1573 = vmatprep.subr.bf16.mxu0 %v1732_v0 }
 0x4d7   :  { %1575 = vmatpush3.bf16.msra.mxu0 %v1839_v28 }
 0x4d8   :  { %1576 = vmatprep.subr.bf16.mxu0 %v1732_v0 }
 0x4db   :  { %1578 = vmatpush3.bf16.msra.mxu0 %v1843_v32  ;;  %v935_v32 = vsel %vm256_vm8, 1.0, %v1734_v1 }
 0x4dc   :  { %1579 = vmatprep.subr.bf16.mxu0 %v1732_v0 }
 0x4df   :  { %1581 = vmatpush3.bf16.msra.mxu0 %v1847_v36 }
 0x55d   :  { %v878_v44 = vpop.xlane.xlu0 %877 }
 0x55e   :  { %v879_v45 = vcvt.f32.s32 %v878_v44 }
 0x560   :  { %v882_v46 = vadd.s32 %v881_v43, %v879_v45 }
 0x562   :  { %v883_v47 = vrot.slane %v882_v46, 4 }
 0x564   :  { %vm884_vm9 = vcmp.gt.s32.totalorder %v882_v46, %v883_v47 }
 0x565   :  { %v885_v48 = vsel %vm884_vm9, %v882_v46, %v883_v47 }
 0x566   :  { %v886_v49 = vrot.slane %v885_v48, 2 }
 0x568   :  { %vm887_vm10 = vcmp.gt.s32.totalorder %v885_v48, %v886_v49 }
 0x569   :  { %v888_v51 = vsel %vm887_vm10, %v885_v48, %v886_v49 }
 0x56a   :  { %v889_v53 = vrot.slane %v888_v51, 1 }
 0x56c   :  { %vm890_vm11 = vcmp.gt.s32.totalorder %v888_v51, %v889_v53 }
 0x56d   :  { %v891_v54 = vsel %vm890_vm11, %v888_v51, %v889_v53 }
 0x56e   :  { %1582 = vpush %v891_v54 }
 0x595   :  { %v711_v38 = vpop.f32.mrb[12].mxu0 }
 0x596   :  { %v715_v39 = vadd.f32 %v711_v38, %v237_v24  ;;  %v1319_v28 = vpop.f32.mrb[13].mxu0 }
 0x598   :  { %1623 = vtanh.f32 %v715_v39 }
 0x59f   :  { %s1583_s4 = spop %1582 }
 0x5a0   :  { %s893_s8 = scvt.s32.f32 %s1583_s4 }
 0x5a2   :  { %v1624_v0 = vpop.eup %1623  ;;  %s894_s10 = smax.f32 %s1736_s9, %s893_s8 }
 0x5a3   :  { %1353 = vmatmul.mubr.f32.vlgmr.msra.gmra.mrb[6].mxu1 %v1624_v0  ;;  %v717_v36 = vmul.f32 %v1624_v0, %v935_v32  ;;  %v895_v55 = vstv %s894_s10 }
 0x5a4   :  { %1625 = vrcp.f32 %v895_v55 }
 0x5a5   :  { %v718_v41 = vadd.f32 %v717_v36, %v644_v23 }
 0x5ae   :  { %v1626_v56 = vpop.eup %1625 }
 0x5af   :  { %1584 = vpush %v1626_v56 }
 0x5e0   :  { %s1585_s11 = spop %1584 }
 0x5e1   :  { %v898_v13 = vstv %s1585_s11 }
 0x676   :  { %v785_v59 = vpop.f32.mrb[6].mxu1 }
 0x677   :  { %v789_v60 = vadd.f32 %v785_v59, %v242_v57  ;;  %v1354_v61 = vpop.f32.mrb[7].mxu1 }
 0x679   :  { %1627 = vtanh.f32 %v789_v60 }
 0x683   :  { %v1628_v63 = vpop.eup %1627 }
 0x684   :  { %1388 = vmatmul.mubr.f32.vlgmr.msra.gmra.mrb[14].mxu0 %v1628_v63  ;;  %v791_v2 = vmul.f32 %v1628_v63, %v936_v62 }
 0x686   :  { %v792_v3 = vadd.f32 %v791_v2, %v718_v41 }
 0x757   :  { %v859_v5 = vpop.f32.mrb[14].mxu0 }
 0x758   :  { %v863_v7 = vadd.f32 %v859_v5, %v245_v4  ;;  %v1389_v8 = vpop.f32.mrb[15].mxu0 }
 0x75a   :  { %1629 = vtanh.f32 %v863_v7 }
 0x764   :  { %v1630_v50 = vpop.eup %1629 }
 0x765   :  { %v865_v11 = vmul.f32 %v1630_v50, %v937_v9 }
 0x767   :  { %v866_v12 = vadd.f32 %v865_v11, %v792_v3 }
 0x769   :  { %v899_v15 = vmul.f32 %v898_v13, %v866_v12 }
 0x76b   :  { %900 = vst [vmem:[#allocation8] sm:$0xff] %v899_v15 }
 0x76c   :  { %1708 = shalt.err (!%p1705_p0)
}
 0x76d   :  { %s1709_s2 = scalar_lea.hbm %s2045_s5, 128 }
 0x76e   :  { %p1710_p1 = scmp.ne.s32.totalorder %s2045_s5, %s1709_s2  ;;  %p1713_p2 = scmp.lt.u32.totalorder %s1709_s2, %s2045_s5 }
 0x770   :  { %p1715_p3 = pnand %p1713_p2, %p1710_p1 }
 0x772   :  { %1718 = shalt.err (!%p1715_p3)
}
 0x773   :  { %910 = dma.vmem_to_hbm [thread:$0]  %s908_s13, 128, %s2045_s5, [#allocation4]  }
 0x774   :  { %1723 = dma.done.wait [#allocation4], 128  }
 0x775   :  { %1724 = vsyncadd [#allocation4], 4294967168 }
 0x776   :  { %914 = vsyncpa [#allocation3], 1 }
 0x777   :  { %915 = vsyncpa [#allocation6], 1 }
 0x778   :  { %916 = vsyncpa [#allocation4], 1 }

</bundles_post_ra>
